<compile_context>
chip_gen: v7x
topology: tpu7x:2x2x1
jax: 0.10.0
libtpu: 0.0.40
codegen_flags: <defaults>
</compile_context>

<pallas_src>
import functools

import jax
import jax.numpy as jnp
from jax.experimental import pallas as pl
from jax.experimental.pallas import tpu as pltpu


def _make_divisible(ch, divisor=8, min_ch=None):
    if min_ch is None:
        min_ch = divisor
    new_ch = max(min_ch, int(ch + divisor / 2) // divisor * divisor)
    if new_ch < 0.9 * ch:
        new_ch += divisor
    return new_ch


def _se_kernel(x_ref, w1t_ref, b1_ref, w2t_ref, b2_ref, o_ref, *, inv_hw: float):
    # x_ref / o_ref: (Nb, C, HW)
    # w1t_ref: (C, S)   b1_ref: (1, S)
    # w2t_ref: (S, C)   b2_ref: (1, C)

    # Global average pool. The f32 upcast is fused into the reduction so only
    # f32 accumulators stay live (no full-tile f32 temporary for bf16 inputs).
    pooled = jnp.sum(x_ref[...], axis=2, dtype=jnp.float32) * inv_hw        # (Nb, C)

    # fc1 (1x1 conv) + ReLU, row-vector form.
    h = jnp.dot(pooled, w1t_ref[...], preferred_element_type=jnp.float32)
    h = jnp.maximum(h + b1_ref[...], 0.0)                                   # (Nb, S)

    # fc2 (1x1 conv) + hardsigmoid: clip(x + 3, 0, 6) / 6.
    s = jnp.dot(h, w2t_ref[...], preferred_element_type=jnp.float32)
    s = jnp.clip(s + b2_ref[...] + 3.0, 0.0, 6.0) * (1.0 / 6.0)             # (Nb, C)
    # Gate is rounded to the activation dtype before the multiply (matches
    # PyTorch-in-bf16 semantics; slightly different from an all-f32 reference).
    s = s.astype(o_ref.dtype)

    # Re-read x from the VMEM ref (short live range for the big tile) and scale.
    o_ref[...] = x_ref[...] * s[:, :, None]


def _pick_batch_block(n, per_sample_bytes):
    """How many batch elements to fuse per grid step.

    Targets ~8 MiB blocks (HBM roofline territory, amortizes the ~0.35 us
    per-step overhead) but prefers >= 8 grid steps — v7x shards the parallel
    grid axis across its 2 TensorCores (>= 4 steps each), and even on the
    single-TC v5e/v6e multiple steps are required to overlap input DMA,
    compute, and output writeback — as long as each block stays >= ~1 MiB.
    """
    target_block = 8 << 20   # upper bound on block bytes
    min_block = 1 << 20      # don't split below this when chasing more steps

    nb = max(1, min(n, target_block // max(per_sample_bytes, 1)))
    steps = pl.cdiv(n, nb)
    for want_steps in (8, 4, 2):
        if steps >= want_steps:
            break
        cand = pl.cdiv(n, want_steps)
        if cand * per_sample_bytes >= min_block:
            nb = cand
            break
    return nb


def squeeze_excitation(x, w1, b1, w2, b2):
    """x: (N, C, H, W). w1: (S, C), b1: (S,), w2: (C, S), b2: (C,)."""
    N, C, H, W = x.shape
    S = w1.shape[0]
    HW = H * W

    # Metadata-only reshape: no extra HBM pass, single NCHW layout throughout.
    x3 = x.reshape(N, C, HW)

    per_sample_bytes = C * HW * x.dtype.itemsize
    Nb = _pick_batch_block(N, per_sample_bytes)
    grid = (pl.cdiv(N, Nb),)

    # Pre-transpose weights (tiny) so the kernel does row-vector matmuls.
    w1t = jnp.transpose(w1)        # (C, S)
    w2t = jnp.transpose(w2)        # (S, C)
    b1r = b1.reshape(1, S)
    b2r = b2.reshape(1, C)

    kernel = functools.partial(_se_kernel, inv_hw=1.0 / HW)

    out = pl.pallas_call(
        kernel,
        out_shape=jax.ShapeDtypeStruct((N, C, HW), x.dtype),
        grid_spec=pltpu.PrefetchScalarGridSpec(
            num_scalar_prefetch=0,
            grid=grid,
            in_specs=[
                pl.BlockSpec((Nb, C, HW), lambda n: (n, 0, 0)),
                # Constant index_maps keep the tiny weights/biases VMEM-resident
                # across all grid steps.
                pl.BlockSpec((C, S), lambda n: (0, 0)),
                pl.BlockSpec((1, S), lambda n: (0, 0)),
                pl.BlockSpec((S, C), lambda n: (0, 0)),
                pl.BlockSpec((1, C), lambda n: (0, 0)),
            ],
            out_specs=pl.BlockSpec((Nb, C, HW), lambda n: (n, 0, 0)),
        ),
        compiler_params=pltpu.CompilerParams(
            dimension_semantics=("parallel",),
            # 2x(in)+2x(out) double-buffered 8 MiB blocks = 32 MiB; 48 MiB
            # scoped limit leaves headroom and is safe on v7x (64 MiB physical
            # per TC) as well as v5e/v6e (128 MiB).
            vmem_limit_bytes=48 << 20,
        ),
    )(x3, w1t, b1r, w2t, b2r)

    return out.reshape(N, C, H, W)


def _reference(x, w1, b1, w2, b2):
    pooled = jnp.mean(x, axis=(2, 3), keepdims=True)                 # (N,C,1,1)
    h = jnp.einsum("sc,ncij->nsij", w1, pooled) + b1[None, :, None, None]
    h = jnp.maximum(h, 0.0)
    s = jnp.einsum("cs,nsij->ncij", w2, h) + b2[None, :, None, None]
    s = jnp.clip(s + 3.0, 0.0, 6.0) / 6.0
    return s * x


if __name__ == "__main__":
    # Module config: input_c=16, squeeze_factor=4 -> squeeze_c = _make_divisible(4, 8) = 8
    input_c = 16
    squeeze_c = _make_divisible(input_c // 4, 8)

    N, H, W = 2, 16, 16
    key = jax.random.PRNGKey(0)
    kx, k1, k2, k3, k4 = jax.random.split(key, 5)

    x = jax.random.normal(kx, (N, input_c, H, W), dtype=jnp.float32)
    # fc1: Conv2d(input_c, squeeze_c, 1) -> weight (squeeze_c, input_c), bias (squeeze_c,)
    w1 = jax.random.normal(k1, (squeeze_c, input_c), dtype=jnp.float32) * 0.1
    b1 = jax.random.normal(k2, (squeeze_c,), dtype=jnp.float32) * 0.1
    # fc2: Conv2d(squeeze_c, input_c, 1) -> weight (input_c, squeeze_c), bias (input_c,)
    w2 = jax.random.normal(k3, (input_c, squeeze_c), dtype=jnp.float32) * 0.1
    b2 = jax.random.normal(k4, (input_c,), dtype=jnp.float32) * 0.1

    out = squeeze_excitation(x, w1, b1, w2, b2)
    out = jax.block_until_ready(out)

    ref = _reference(x, w1, b1, w2, b2)
    assert out.shape == ref.shape
    assert jnp.allclose(out, ref, atol=1e-5, rtol=1e-5), "mismatch vs reference"

    print("KERNEL_OK")
</pallas_src>

<mosaic_0001>
module attributes {stable_mosaic.version = 11 : i64} {
  func.func @_se_kernel(%arg0: i32, %arg1: memref<2x16x256xf32, #tpu.memory_space<vmem>>, %arg2: memref<16x8xf32, #tpu.memory_space<vmem>>, %arg3: memref<1x8xf32, #tpu.memory_space<vmem>>, %arg4: memref<8x16xf32, #tpu.memory_space<vmem>>, %arg5: memref<1x16xf32, #tpu.memory_space<vmem>>, %arg6: memref<2x16x256xf32, #tpu.memory_space<vmem>>) attributes {dimension_semantics = [#tpu.dimension_semantics<parallel>], iteration_bounds = array<i64: 1>, scalar_prefetch = 0 : i64, scratch_operands = 0 : i64, tpu.core_type = #tpu.core_type<tc>, window_params = [{transform_indices = @transform_0, window_bounds = array<i64: 2, 16, 256>}, {pipeline_mode = #tpu.pipeline_mode<synchronous>, transform_indices = @transform_1, window_bounds = array<i64: 16, 8>}, {pipeline_mode = #tpu.pipeline_mode<synchronous>, transform_indices = @transform_2, window_bounds = array<i64: 1, 8>}, {pipeline_mode = #tpu.pipeline_mode<synchronous>, transform_indices = @transform_3, window_bounds = array<i64: 8, 16>}, {pipeline_mode = #tpu.pipeline_mode<synchronous>, transform_indices = @transform_4, window_bounds = array<i64: 1, 16>}, {transform_indices = @transform_5, window_bounds = array<i64: 2, 16, 256>}]} {
    %c0 = arith.constant 0 : index
    %c0_0 = arith.constant 0 : index
    %c0_1 = arith.constant 0 : index
    %0 = vector.load %arg1[%c0, %c0_0, %c0_1] : memref<2x16x256xf32, #tpu.memory_space<vmem>>, vector<2x16x256xf32>
    %cst = arith.constant dense<0.000000e+00> : vector<2x16xf32>
    %1 = vector.multi_reduction <add>, %0, %cst [2] : vector<2x16x256xf32> to vector<2x16xf32>
    %cst_2 = arith.constant 3.906250e-03 : f32
    %2 = vector.broadcast %cst_2 : f32 to vector<2x16xf32>
    %3 = arith.mulf %1, %2 : vector<2x16xf32>
    %c0_3 = arith.constant 0 : index
    %c0_4 = arith.constant 0 : index
    %4 = vector.load %arg2[%c0_3, %c0_4] : memref<16x8xf32, #tpu.memory_space<vmem>>, vector<16x8xf32>
    %cst_5 = arith.constant dense<0.000000e+00> : vector<2x8xf32>
    %5 = tpu.matmul %3, %4, %cst_5 {dimension_numbers = #tpu.dot_dimension_numbers<[1], [0], [0], [1], [0, 0, 1, 1], [], []>} : vector<2x16xf32>, vector<16x8xf32>, vector<2x8xf32> -> vector<2x8xf32>
    %c0_6 = arith.constant 0 : index
    %c0_7 = arith.constant 0 : index
    %6 = vector.load %arg3[%c0_6, %c0_7] : memref<1x8xf32, #tpu.memory_space<vmem>>, vector<1x8xf32>
    %7 = vector.broadcast %6 : vector<1x8xf32> to vector<2x8xf32>
    %8 = arith.addf %5, %7 : vector<2x8xf32>
    %cst_8 = arith.constant 0.000000e+00 : f32
    %9 = vector.broadcast %cst_8 : f32 to vector<2x8xf32>
    %10 = arith.maximumf %8, %9 : vector<2x8xf32>
    %c0_9 = arith.constant 0 : index
    %c0_10 = arith.constant 0 : index
    %11 = vector.load %arg4[%c0_9, %c0_10] : memref<8x16xf32, #tpu.memory_space<vmem>>, vector<8x16xf32>
    %cst_11 = arith.constant dense<0.000000e+00> : vector<2x16xf32>
    %12 = tpu.matmul %10, %11, %cst_11 {dimension_numbers = #tpu.dot_dimension_numbers<[1], [0], [0], [1], [0, 0, 1, 1], [], []>} : vector<2x8xf32>, vector<8x16xf32>, vector<2x16xf32> -> vector<2x16xf32>
    %c0_12 = arith.constant 0 : index
    %c0_13 = arith.constant 0 : index
    %13 = vector.load %arg5[%c0_12, %c0_13] : memref<1x16xf32, #tpu.memory_space<vmem>>, vector<1x16xf32>
    %14 = vector.broadcast %13 : vector<1x16xf32> to vector<2x16xf32>
    %15 = arith.addf %12, %14 : vector<2x16xf32>
    %cst_14 = arith.constant 3.000000e+00 : f32
    %16 = vector.broadcast %cst_14 : f32 to vector<2x16xf32>
    %17 = arith.addf %15, %16 : vector<2x16xf32>
    %cst_15 = arith.constant 0.000000e+00 : f32
    %cst_16 = arith.constant 6.000000e+00 : f32
    %18 = vector.broadcast %cst_15 : f32 to vector<2x16xf32>
    %19 = arith.maximumf %18, %17 : vector<2x16xf32>
    %20 = vector.broadcast %cst_16 : f32 to vector<2x16xf32>
    %21 = arith.minimumf %20, %19 : vector<2x16xf32>
    %cst_17 = arith.constant 0.166666672 : f32
    %22 = vector.broadcast %cst_17 : f32 to vector<2x16xf32>
    %23 = arith.mulf %21, %22 : vector<2x16xf32>
    %c0_18 = arith.constant 0 : index
    %c0_19 = arith.constant 0 : index
    %c0_20 = arith.constant 0 : index
    %24 = vector.load %arg1[%c0_18, %c0_19, %c0_20] : memref<2x16x256xf32, #tpu.memory_space<vmem>>, vector<2x16x256xf32>
    %25 = vector.shape_cast %23 : vector<2x16xf32> to vector<2x16x1xf32>
    %26 = vector.broadcast %25 : vector<2x16x1xf32> to vector<2x16x256xf32>
    %27 = arith.mulf %24, %26 : vector<2x16x256xf32>
    %c0_21 = arith.constant 0 : index
    %c0_22 = arith.constant 0 : index
    %c0_23 = arith.constant 0 : index
    %28 = vector.load %arg6[%c0_21, %c0_22, %c0_23] : memref<2x16x256xf32, #tpu.memory_space<vmem>>, vector<2x16x256xf32>
    tpu.vector_store %arg6[%c0_21, %c0_22, %c0_23], %27 {strides = array<i32>} : memref<2x16x256xf32, #tpu.memory_space<vmem>>, vector<2x16x256xf32>,
    return
  }
  func.func @transform_0(%arg0: i32) -> (i32, i32, i32) {
    %c0_i32 = arith.constant 0 : i32
    %c0_i32_0 = arith.constant 0 : i32
    %c0_i32_1 = arith.constant 0 : i32
    return %arg0, %c0_i32, %c0_i32_0 : i32, i32, i32
  }
  func.func @transform_1(%arg0: i32) -> (i32, i32) {
    %c0_i32 = arith.constant 0 : i32
    %c0_i32_0 = arith.constant 0 : i32
    %c0_i32_1 = arith.constant 0 : i32
    return %c0_i32, %c0_i32_0 : i32, i32
  }
  func.func @transform_2(%arg0: i32) -> (i32, i32) {
    %c0_i32 = arith.constant 0 : i32
    %c0_i32_0 = arith.constant 0 : i32
    %c0_i32_1 = arith.constant 0 : i32
    return %c0_i32, %c0_i32_0 : i32, i32
  }
  func.func @transform_3(%arg0: i32) -> (i32, i32) {
    %c0_i32 = arith.constant 0 : i32
    %c0_i32_0 = arith.constant 0 : i32
    %c0_i32_1 = arith.constant 0 : i32
    return %c0_i32, %c0_i32_0 : i32, i32
  }
  func.func @transform_4(%arg0: i32) -> (i32, i32) {
    %c0_i32 = arith.constant 0 : i32
    %c0_i32_0 = arith.constant 0 : i32
    %c0_i32_1 = arith.constant 0 : i32
    return %c0_i32, %c0_i32_0 : i32, i32
  }
  func.func @transform_5(%arg0: i32) -> (i32, i32, i32) {
    %c0_i32 = arith.constant 0 : i32
    %c0_i32_0 = arith.constant 0 : i32
    %c0_i32_1 = arith.constant 0 : i32
    return %arg0, %c0_i32, %c0_i32_0 : i32, i32, i32
  }
}

</mosaic_0001>

<bundles_post_ra>
// kernel: tpu_custom_call.1
= control target key start
LH: loop header
LB: loop body
LE: loop exit
PB: predicated region body
PF: predicated region fallthrough
CT: control target
= control target key end

     0   :  { %10 = vsyncpa [#allocation3], 0  ;;  %s504_s0 = inlined_call_operand.hbm [shape: f32[2,16,256], index: 0, kind: input, shape index: {}]   ;;  %s505_s1 = inlined_call_operand.vmem [shape: f32[16,8], index: 1, kind: input, shape index: {}]   ;;  %s506_s2 = inlined_call_operand.vmem [shape: f32[1,8], index: 2, kind: input, shape index: {}]   ;;  %s507_s3 = inlined_call_operand.vmem [shape: f32[8,16], index: 3, kind: input, shape index: {}]   ;;  %s508_s4 = inlined_call_operand.vmem [shape: f32[1,16], index: 4, kind: input, shape index: {}]   ;;  %s509_s5 = inlined_call_operand.hbm [shape: f32[2,16,256], index: 5, kind: output, shape index: {}]  }
   0x1   :  { %11 = vsyncpa [#allocation4], 0  ;;  %s390_s18 = smov [#allocation2]   ;;  %s342_s22 = scalar_lea.hbm %s504_s0, 1024 }
   0x2   :  { %s17_s19 = sshll.u32 %s390_s18, 4  ;;  %p343_p0 = scmp.ne.s32.totalorder %s504_s0, %s342_s22  ;;  %s18_s19 = int_to_ptr.vmem [resolvable:$true] %s17_s19 }
   0x3   :  { %p346_p1 = scmp.lt.u32.totalorder %s342_s22, %s504_s0 }
   0x5   :  { %p348_p2 = pnand %p346_p1, %p343_p0 }
   0x7   :  { %351 = shalt.err (!%p348_p2)
}
   0x8   :  { %s352_s27 = scalar_lea.vmem %s18_s19, 1024  ;;  %p357_p4 = scmp.lt.s32.totalorder %s18_s19, %s18_s19 }
   0x9   :  { %p353_p3 = scmp.ne.s32.totalorder %s18_s19, %s352_s27  ;;  %p358_p5 = scmp.lt.s32.totalorder %s352_s27, %s352_s27 }
   0xb   :  { %p359_p6 = por %p358_p5, %p357_p4 }
   0xd   :  { %p360_p7 = pnand %p359_p6, %p353_p3 }
   0xf   :  { %363 = shalt.err (!%p360_p7)
}
  0x10   :  { %s391_s28 = smov 256   ;;  %s392_s29 = smov 16  }
  0x11   :  { %23 = dma.hbm_to_vmem [thread:$0]  %s504_s0, 1024, %s18_s19, [#allocation3], %s391_s28, %s391_s28, %s392_s29  }
  0x12   :  { %386 = dma.done.wait [#allocation3], 1024  }
  0x13   :  { %387 = vsyncadd [#allocation3], 4294966272  ;;  %v442_v0 = vld [vmem:[#allocation2 + $0x20] sm:$0xff]  ;;  %v444_v1 = vld [vmem:[#allocation2 + $0x28] sm:$0xff]  ;;  %v393_v15 = vmov 0.0|0.0   ;;  %vm394_vm0 = vmmov 0   ;;  %v72_v17 = vlaneseq }
  0x14   :  { %v446_v2 = vld [vmem:[#allocation2] sm:$0xff]  ;;  %v49_v3 = vadd.f32 %v444_v1, %v442_v0  ;;  %v450_v4 = vld [vmem:[#allocation2 + $0x8] sm:$0xff]  ;;  %v452_v5 = vld [vmem:[#allocation2 + $0x30] sm:$0xff]  ;;  %332 = vmatprep.subr.bf16.mxu0 %v393_v15  ;;  %v395_v16 = vmov 0.0   ;;  %vm83_vm1 = vcmask 130112   ;;  %vm94_vm2 = vcmask 1041409  }
  0x15   :  { %v454_v6 = vld [vmem:[#allocation2 + $0x38] sm:$0xff]  ;;  %v43_v7 = vadd.f32 %v450_v4, %v446_v2  ;;  %v458_v8 = vld [vmem:[#allocation2 + $0x10] sm:$0xff]  ;;  %v59_v12 = vld [vmem:[%s505_s1] sm:$0xff]  ;;  %324 = vmatprep.mubr.msk.f32.mxu0 %vm394_vm0, %v395_v16  ;;  %327 = vmatprep.subr.mxu1 %v395_v16  ;;  %v73_v18 = vand.u32 127, %v72_v17  ;;  %v75_v19 = vshrl.u32 %v72_v17, 7  ;;  %vm96_vm3 = vcmask 130048  }
  0x16   :  { %v460_v9 = vld [vmem:[#allocation2 + $0x18] sm:$0xff]  ;;  %50 = vadd.xlane.f32.xlu1 %v49_v3  ;;  %v52_v10 = vadd.f32 %v454_v6, %v452_v5  ;;  %v60_v13 = vld [vmem:[%s505_s1 + $0x8] sm:$0xff]  ;;  %329 = vmatprep.mubr.msk.f32.mxu1 %vm394_vm0, %v395_v16  ;;  %v170_v38 = vld [vmem:[%s507_s3] sm:$0xff]  ;;  %vm178_vm4 = vcmask 64512  }
  0x17   :  { %44 = vadd.xlane.f32.xlu0 %v43_v7  ;;  %v46_v11 = vadd.f32 %v460_v9, %v458_v8  ;;  %v333_v14 = vpack.c.bf16 %v60_v13, %v59_v12  ;;  %v78_v20 = vadd.s32 4294967288, %v73_v18  ;;  %v76_v23 = vsub.s32 %v73_v18, %v75_v19  ;;  %328 = vmatpush3.msra.mxu1 %v170_v38  ;;  %v311_v39 = vld [vmem:[%s506_s2] ss:$0 sm:$0xff]  ;;  %s396_s2 = smov [#allocation5]  }
  0x18   :  { %v313_v44 = vld [vmem:[%s508_s4] ss:$0 sm:$0xff]  ;;  %v258_v51 = vsub.s32 0, %v75_v19  ;;  %v269_v54 = vsub.s32 1, %v75_v19  ;;  %s299_s3 = sshll.u32 %s396_s2, 4  ;;  %s300_s3 = int_to_ptr.vmem [resolvable:$true] %s299_s3 }
  0x19   :  { %334 = vmatpush3.bf16.msra.mxu0 %v333_v14  ;;  %v81_v25 = vsub.s32 %v78_v20, %v75_v19  ;;  %s364_s4 = scalar_lea.vmem %s300_s3, 1024  ;;  %p369_p9 = scmp.lt.s32.totalorder %s300_s3, %s300_s3 }
  0x1a   :  { %53 = vadd.xlane.f32.xlu1 %v52_v10  ;;  %p365_p8 = scmp.ne.s32.totalorder %s300_s3, %s364_s4  ;;  %p370_p10 = scmp.lt.s32.totalorder %s364_s4, %s364_s4 }
  0x1b   :  { %47 = vadd.xlane.f32.xlu0 %v46_v11 }
  0x1c   :  { %p371_p11 = por %p370_p10, %p369_p9 }
  0x1e   :  { %p372_p12 = pnand %p371_p11, %p365_p8 }
  0xa3   :  { %v51_v21 = vpop.xlane.xlu1 %50 }
  0xa4   :  { %v45_v22 = vpop.xlane.xlu0 %44  ;;  %v57_v24 = vmul.f32 0.00390625, %v51_v21 }
  0xa5   :  { %v55_v26 = vmul.f32 0.00390625, %v45_v22 }
  0xa6   :  { %v88_v31 = vrot.slane %v57_v24, %v76_v23 }
  0xa7   :  { %v54_v27 = vpop.xlane.xlu1 %53  ;;  %v77_v33 = vrot.slane %v55_v26, %v76_v23 }
  0xa8   :  { %v58_v28 = vmul.f32 0.00390625, %v54_v27  ;;  %v48_v29 = vpop.xlane.xlu0 %47 }
  0xa9   :  { %v56_v30 = vmul.f32 0.00390625, %v48_v29 }
  0xaa   :  { %v92_v32 = vrot.slane %v58_v28, %v81_v25 }
  0xab   :  { %v82_v34 = vrot.slane %v56_v30, %v81_v25 }
  0xac   :  { %v93_v35 = vsel %vm83_vm1, %v92_v32, %v88_v31 }
  0xad   :  { %v84_v36 = vsel %vm83_vm1, %v82_v34, %v77_v33 }
  0xae   :  { %v95_v37 = vsel %vm94_vm2, %v93_v35, %v84_v36 }
  0xaf   :  { %325 = vmatmul.mubr.msk.f32.vlgmr.msra.gmra.mrb[0].mxu0 %vm96_vm3, %v95_v37 }
 0x182   :  { %v165_v40 = vpop.f32.mrb[0].mxu0 }
 0x183   :  { %v166_v41 = vadd.f32 %v311_v39, %v165_v40  ;;  %v326_v42 = vpop.f32.mrb[1].mxu0 }
 0x185   :  { %v169_v43 = vmax.f32 %v166_v41, 0.0 }
 0x187   :  { %330 = vmatmul.mubr.msk.f32.vlgmr.msra.gmra.mrb[0].mxu1 %vm178_vm4, %v169_v43 }
 0x25a   :  { %v248_v45 = vpop.f32.mrb[0].mxu1 }
 0x25b   :  { %v249_v46 = vadd.f32 %v313_v44, %v248_v45  ;;  %v331_v47 = vpop.f32.mrb[1].mxu1 }
 0x25d   :  { %v252_v48 = vadd.f32 3.0, %v249_v46 }
 0x25f   :  { %v253_v49 = vmax.f32 %v252_v48, 0.0 }
 0x261   :  { %v254_v50 = vmin.f32 %v253_v49, 6.0 }
 0x263   :  { %v255_v52 = vmul.f32 0.16666667, %v254_v50 }
 0x265   :  { %v259_v53 = vrot.slane %v255_v52, %v258_v51  ;;  %v270_v55 = vrot.slane %v255_v52, %v269_v54 }
 0x267   :  { %265 = vbcast.lane.b32.xlu1 %v259_v53, 264  ;;  %261 = vbcast.lane.b32.xlu0 %v259_v53, 256 }
 0x26b   :  { %272 = vbcast.lane.b32.xlu1 %v270_v55, 256 }
 0x26f   :  { %276 = vbcast.lane.b32.xlu1 %v270_v55, 264 }
 0x2d9   :  { %v266_v56 = vpop.permute.xlu1 %265  ;;  %v262_v57 = vpop.permute.xlu0 %261 }
 0x2da   :  { %v280_v58 = vmul.f32 %v266_v56, %v458_v8  ;;  %v281_v59 = vmul.f32 %v266_v56, %v460_v9  ;;  %v278_v60 = vmul.f32 %v262_v57, %v446_v2  ;;  %v279_v61 = vmul.f32 %v262_v57, %v450_v4 }
 0x2dc   :  { %288 = vst [vmem:[#allocation5 + $0x10] sm:$0xff] %v280_v58  ;;  %289 = vst [vmem:[#allocation5 + $0x18] sm:$0xff] %v281_v59 }
 0x2dd   :  { %286 = vst [vmem:[#allocation5] sm:$0xff] %v278_v60  ;;  %287 = vst [vmem:[#allocation5 + $0x8] sm:$0xff] %v279_v61  ;;  %v273_v62 = vpop.permute.xlu1 %272 }
 0x2de   :  { %v282_v63 = vmul.f32 %v273_v62, %v442_v0  ;;  %v283_v3 = vmul.f32 %v273_v62, %v444_v1 }
 0x2e0   :  { %290 = vst [vmem:[#allocation5 + $0x20] sm:$0xff] %v282_v63  ;;  %291 = vst [vmem:[#allocation5 + $0x28] sm:$0xff] %v283_v3 }
 0x2e1   :  { %v277_v7 = vpop.permute.xlu1 %276 }
 0x2e2   :  { %v284_v8 = vmul.f32 %v277_v7, %v452_v5  ;;  %v285_v2 = vmul.f32 %v277_v7, %v454_v6 }
 0x2e4   :  { %292 = vst [vmem:[#allocation5 + $0x30] sm:$0xff] %v284_v8  ;;  %293 = vst [vmem:[#allocation5 + $0x38] sm:$0xff] %v285_v2 }
 0x2e5   :  { %375 = shalt.err (!%p372_p12)
}
 0x2e6   :  { %s376_s17 = scalar_lea.hbm %s509_s5, 1024 }
 0x2e7   :  { %p377_p13 = scmp.ne.s32.totalorder %s509_s5, %s376_s17  ;;  %p380_p0 = scmp.lt.u32.totalorder %s376_s17, %s509_s5 }
 0x2e9   :  { %p382_p1 = pnand %p380_p0, %p377_p13 }
 0x2eb   :  { %385 = shalt.err (!%p382_p1)
}
 0x2ec   :  { %305 = dma.vmem_to_hbm [thread:$0]  %s300_s3, 1024, %s509_s5, [#allocation4], %s391_s28, %s391_s28, %s392_s29  }
 0x2ed   :  { %388 = dma.done.wait [#allocation4], 1024  }
 0x2ee   :  { %389 = vsyncadd [#allocation4], 4294966272 }
 0x2ef   :  { %309 = vsyncpa [#allocation3], 1 }
 0x2f0   :  { %310 = vsyncpa [#allocation4], 1 }

</bundles_post_ra>
